<compile_context>
chip_gen: v7x
topology: tpu7x:2x2x1
jax: 0.10.0
libtpu: 0.0.40
codegen_flags: <defaults>
</compile_context>

<pallas_src>
import numpy as np
import jax
import jax.numpy as jnp
from jax.experimental import pallas as pl
from jax.experimental.pallas import tpu as pltpu


def make_kernel_np(k):
    """NumPy port of models/discriminator/op.make_kernel (deterministic, static)."""
    k = np.asarray(k, dtype=np.float32)
    if k.ndim == 1:
        k = k[None, :] * k[:, None]
    k = k / k.sum()
    return k


def _separable_blur_kernel(kv_flip, kw_flip, Hc, Wc, pad_t, pad_l, Hp, Wp, Ho, Wo, BT):
    """Separable (1-D x 1-D) blur on a lane-dense (H, W, BT) tile."""
    Kh, Kw = len(kv_flip), len(kw_flip)
    pad_b = Hp - pad_t - Hc
    pad_r = Wp - pad_l - Wc

    def kernel(x_ref, o_ref, xp_ref, mid_ref):
        # --- fused zero-padding: zero only the border slabs (corners once),
        #     cast + write the interior exactly once ---
        if pad_t > 0:
            xp_ref[0:pad_t, :, :] = jnp.zeros((pad_t, Wp, BT), jnp.float32)
        if pad_b > 0:
            xp_ref[pad_t + Hc:Hp, :, :] = jnp.zeros((pad_b, Wp, BT), jnp.float32)
        if pad_l > 0:
            xp_ref[pad_t:pad_t + Hc, 0:pad_l, :] = jnp.zeros((Hc, pad_l, BT), jnp.float32)
        if pad_r > 0:
            xp_ref[pad_t:pad_t + Hc, pad_l + Wc:Wp, :] = jnp.zeros((Hc, pad_r, BT), jnp.float32)
        xp_ref[pad_t:pad_t + Hc, pad_l:pad_l + Wc, :] = x_ref[...].astype(jnp.float32)

        # --- horizontal (W) 1-D pass -> mid scratch (all slices lane-aligned;
        #     the tap chain fuses into mul-adds held in vregs per tile) ---
        mid = kw_flip[0] * xp_ref[:, 0:Wo, :]
        for j in range(1, Kw):
            mid = mid + kw_flip[j] * xp_ref[:, j:j + Wo, :]
        mid_ref[...] = mid

        # --- vertical (H) 1-D pass -> output (first-axis slices are free) ---
        acc = kv_flip[0] * mid_ref[0:Ho, :, :]
        for i in range(1, Kh):
            acc = acc + kv_flip[i] * mid_ref[i:i + Ho, :, :]
        o_ref[...] = acc.astype(o_ref.dtype)

    return kernel


def _full_blur_kernel(taps2d, Hc, Wc, pad_t, pad_l, Hp, Wp, Ho, Wo, BT):
    """General 2-D (possibly non-separable) kernel path, same lane-dense layout."""
    Kh, Kw = len(taps2d), len(taps2d[0])
    pad_b = Hp - pad_t - Hc
    pad_r = Wp - pad_l - Wc

    def kernel(x_ref, o_ref, xp_ref):
        if pad_t > 0:
            xp_ref[0:pad_t, :, :] = jnp.zeros((pad_t, Wp, BT), jnp.float32)
        if pad_b > 0:
            xp_ref[pad_t + Hc:Hp, :, :] = jnp.zeros((pad_b, Wp, BT), jnp.float32)
        if pad_l > 0:
            xp_ref[pad_t:pad_t + Hc, 0:pad_l, :] = jnp.zeros((Hc, pad_l, BT), jnp.float32)
        if pad_r > 0:
            xp_ref[pad_t:pad_t + Hc, pad_l + Wc:Wp, :] = jnp.zeros((Hc, pad_r, BT), jnp.float32)
        xp_ref[pad_t:pad_t + Hc, pad_l:pad_l + Wc, :] = x_ref[...].astype(jnp.float32)

        acc = None
        for i in range(Kh):
            for j in range(Kw):
                w = taps2d[i][j]
                if w == 0.0:
                    continue
                term = w * xp_ref[i:i + Ho, j:j + Wo, :]
                acc = term if acc is None else acc + term
        if acc is None:
            acc = jnp.zeros((Ho, Wo, BT), jnp.float32)
        o_ref[...] = acc.astype(o_ref.dtype)

    return kernel


def _vmem_budget():
    """Pick a scoped-VMEM limit and a tile budget that are safe on v5e/v6e/v7x."""
    try:
        cap = int(pltpu.get_tpu_info().vmem_capacity_bytes)
    except Exception:
        cap = 64 * 1024 * 1024  # conservative (v7x per-TC VMEM)
    # Leave headroom below physical capacity for compiler-internal scratch.
    vmem_limit = max(32 * 1024 * 1024, min(cap - 16 * 1024 * 1024, 64 * 1024 * 1024))
    budget = vmem_limit // 2 - 2 * 1024 * 1024
    return vmem_limit, budget


def blur(x, kernel_taps=(1, 3, 3, 1), pad=(2, 1), upsample_factor=1):
    """Pallas implementation of Blur.forward for NCHW input `x`."""
    k_arr = np.asarray(kernel_taps, dtype=np.float32)
    pad0, pad1 = int(pad[0]), int(pad[1])
    N, C, H, W = x.shape

    # Negative pads are crops (upfirdn2d semantics) -- cheap wrapper slicing.
    crop0, crop1 = max(-pad0, 0), max(-pad1, 0)
    xc = x[:, :, crop0:H - crop1, crop0:W - crop1]
    Hc, Wc = xc.shape[2], xc.shape[3]
    pad_t = pad_l = max(pad0, 0)
    pad_b = pad_r = max(pad1, 0)
    Hp, Wp = Hc + pad_t + pad_b, Wc + pad_l + pad_r

    if k_arr.ndim == 1:
        separable = True
        s = float(k_arr.sum())
        k1 = k_arr / s                      # make_kernel: outer(k,k)/sum^2 == outer(k/s, k/s)
        kv = k1 * (float(upsample_factor) ** 2) if upsample_factor > 1 else k1
        kwid = k1
        # F.conv2d applies the flipped kernel -> use flipped taps for the MAC form.
        kv_flip = [float(v) for v in kv[::-1]]
        kw_flip = [float(v) for v in kwid[::-1]]
        Kh = Kw = int(k_arr.shape[0])
    else:
        separable = False
        k2d = k_arr / float(k_arr.sum())
        if upsample_factor > 1:
            k2d = k2d * (float(upsample_factor) ** 2)
        kflip = k2d[::-1, ::-1]
        Kh, Kw = k2d.shape
        taps2d = [[float(kflip[i, j]) for j in range(Kw)] for i in range(Kh)]

    Ho, Wo = Hp - Kh + 1, Wp - Kw + 1
    assert Ho > 0 and Wo > 0, "output spatial size must be positive"

    # ---- lane-dense layout: put B = N*C on the lane (last) axis ----
    B = N * C
    LANES = 128
    Bpad = ((B + LANES - 1) // LANES) * LANES
    x_t = jnp.transpose(xc.reshape(B, Hc, Wc), (1, 2, 0))          # (Hc, Wc, B)
    if Bpad != B:
        x_t = jnp.pad(x_t, ((0, 0), (0, 0), (0, Bpad - B)))

    # ---- choose the lane-block size BT against the chip's VMEM budget ----
    vmem_limit, budget = _vmem_budget()
    itemsize = jnp.dtype(x.dtype).itemsize
    per_lane_bytes = (2 * (Hc * Wc + Ho * Wo) * itemsize           # double-buffered in/out
                      + Hp * Wp * 4                                # padded f32 scratch
                      + (Hp * Wo * 4 if separable else 0))         # separable mid scratch
    nb = Bpad // LANES
    bt_units = max(1, min(nb, budget // max(per_lane_bytes * LANES, 1)))
    if bt_units >= nb and nb >= 2:
        bt_units = nb // 2        # keep >=2 grid steps so v7x's two TensorCores both get work
    while nb % bt_units != 0:     # grid must tile Bpad exactly
        bt_units -= 1
    BT = bt_units * LANES
    grid = (Bpad // BT,)
    # TODO(synk): for very large spatial sizes (block > VMEM even at BT=128) an extra
    # H-tiled grid axis with a (Kh-1)-row halo would be needed; not required at these shapes.

    if separable:
        body = _separable_blur_kernel(kv_flip, kw_flip, Hc, Wc, pad_t, pad_l,
                                      Hp, Wp, Ho, Wo, BT)
        scratch = [pltpu.VMEM((Hp, Wp, BT), jnp.float32),
                   pltpu.VMEM((Hp, Wo, BT), jnp.float32)]
    else:
        body = _full_blur_kernel(taps2d, Hc, Wc, pad_t, pad_l, Hp, Wp, Ho, Wo, BT)
        scratch = [pltpu.VMEM((Hp, Wp, BT), jnp.float32)]

    out_t = pl.pallas_call(
        body,
        out_shape=jax.ShapeDtypeStruct((Ho, Wo, Bpad), x.dtype),
        grid_spec=pltpu.PrefetchScalarGridSpec(
            num_scalar_prefetch=0,
            grid=grid,
            in_specs=[pl.BlockSpec((Hc, Wc, BT), lambda b: (0, 0, b))],
            out_specs=pl.BlockSpec((Ho, Wo, BT), lambda b: (0, 0, b)),
            scratch_shapes=scratch,
        ),
        compiler_params=pltpu.CompilerParams(
            dimension_semantics=("parallel",),
            vmem_limit_bytes=vmem_limit),
    )(x_t)

    # back to NCHW (layout plumbing only)
    out = jnp.transpose(out_t[:, :, :B], (2, 0, 1)).reshape(N, C, Ho, Wo)
    return out


def blur_reference(x, kernel_1d=(1, 3, 3, 1), pad=(2, 1), upsample_factor=1):
    """Independent JAX reference (lax conv) matching upfirdn2d_native semantics."""
    k2d = make_kernel_np(kernel_1d)
    if upsample_factor > 1:
        k2d = k2d * (upsample_factor ** 2)
    kflip = jnp.asarray(k2d[::-1, ::-1].copy())  # conv2d applies flipped kernel
    N, C, H, W = x.shape
    pad0, pad1 = pad
    xp = jnp.pad(
        x,
        ((0, 0), (0, 0),
         (max(pad0, 0), max(pad1, 0)),
         (max(pad0, 0), max(pad1, 0))),
    )
    xp = xp[:, :,
            max(-pad0, 0): xp.shape[2] - max(-pad1, 0),
            max(-pad0, 0): xp.shape[3] - max(-pad1, 0)]
    xr = xp.reshape(N * C, 1, xp.shape[2], xp.shape[3])
    w = kflip[None, None, :, :]
    out = jax.lax.conv_general_dilated(
        xr, w, window_strides=(1, 1), padding="VALID",
        dimension_numbers=("NCHW", "OIHW", "NCHW"))
    return out.reshape(N, C, out.shape[2], out.shape[3])


if __name__ == "__main__":
    key = jax.random.PRNGKey(0)
    N, C, H, W = 2, 4, 16, 16
    x = jax.random.normal(key, (N, C, H, W), dtype=jnp.float32)

    # Standard StyleGAN2 blur config.
    out = blur(x, kernel_taps=(1, 3, 3, 1), pad=(2, 1), upsample_factor=1)
    out = jax.block_until_ready(out)
    ref = blur_reference(x, kernel_1d=(1, 3, 3, 1), pad=(2, 1), upsample_factor=1)
    ref = jax.block_until_ready(ref)
    assert out.shape == ref.shape, (out.shape, ref.shape)
    np.testing.assert_allclose(np.asarray(out), np.asarray(ref), rtol=1e-5, atol=1e-5)

    # Upsample-scaled variant (as used before transposed convs in StyleGAN2).
    out2 = blur(x, kernel_taps=(1, 3, 3, 1), pad=(1, 1), upsample_factor=2)
    out2 = jax.block_until_ready(out2)
    ref2 = blur_reference(x, kernel_1d=(1, 3, 3, 1), pad=(1, 1), upsample_factor=2)
    ref2 = jax.block_until_ready(ref2)
    assert out2.shape == ref2.shape, (out2.shape, ref2.shape)
    np.testing.assert_allclose(np.asarray(out2), np.asarray(ref2), rtol=1e-5, atol=1e-5)

    print("KERNEL_OK")
</pallas_src>

<mosaic_0001>
module attributes {stable_mosaic.version = 11 : i64} {
  func.func @kernel(%arg0: i32, %arg1: memref<16x16x128xf32, #tpu.memory_space<vmem>>, %arg2: memref<16x16x128xf32, #tpu.memory_space<vmem>>, %arg3: memref<19x19x128xf32, #tpu.memory_space<vmem>>, %arg4: memref<19x16x128xf32, #tpu.memory_space<vmem>>) attributes {dimension_semantics = [#tpu.dimension_semantics<parallel>], iteration_bounds = array<i64: 1>, scalar_prefetch = 0 : i64, scratch_operands = 2 : i64, tpu.core_type = #tpu.core_type<tc>, window_params = [{transform_indices = @transform_0, window_bounds = array<i64: 16, 16, 128>}, {transform_indices = @transform_1, window_bounds = array<i64: 16, 16, 128>}]} {
    %cst = arith.constant 0.000000e+00 : f32
    %0 = vector.broadcast %cst : f32 to vector<2x19x128xf32>
    %c0 = arith.constant 0 : index
    %c0_0 = arith.constant 0 : index
    %c0_1 = arith.constant 0 : index
    %1 = vector.load %arg3[%c0, %c0_0, %c0_1] : memref<19x19x128xf32, #tpu.memory_space<vmem>>, vector<2x19x128xf32>
    tpu.vector_store %arg3[%c0, %c0_0, %c0_1], %0 {strides = array<i32>} : memref<19x19x128xf32, #tpu.memory_space<vmem>>, vector<2x19x128xf32>,
    %cst_2 = arith.constant 0.000000e+00 : f32
    %2 = vector.broadcast %cst_2 : f32 to vector<1x19x128xf32>
    %c18 = arith.constant 18 : index
    %c0_3 = arith.constant 0 : index
    %c0_4 = arith.constant 0 : index
    %3 = vector.load %arg3[%c18, %c0_3, %c0_4] : memref<19x19x128xf32, #tpu.memory_space<vmem>>, vector<1x19x128xf32>
    tpu.vector_store %arg3[%c18, %c0_3, %c0_4], %2 {strides = array<i32>} : memref<19x19x128xf32, #tpu.memory_space<vmem>>, vector<1x19x128xf32>,
    %cst_5 = arith.constant 0.000000e+00 : f32
    %4 = vector.broadcast %cst_5 : f32 to vector<16x2x128xf32>
    %c2 = arith.constant 2 : index
    %c0_6 = arith.constant 0 : index
    %c0_7 = arith.constant 0 : index
    %5 = vector.load %arg3[%c2, %c0_6, %c0_7] : memref<19x19x128xf32, #tpu.memory_space<vmem>>, vector<16x2x128xf32>
    tpu.vector_store %arg3[%c2, %c0_6, %c0_7], %4 {strides = array<i32>} : memref<19x19x128xf32, #tpu.memory_space<vmem>>, vector<16x2x128xf32>,
    %cst_8 = arith.constant 0.000000e+00 : f32
    %6 = vector.broadcast %cst_8 : f32 to vector<16x1x128xf32>
    %c2_9 = arith.constant 2 : index
    %c18_10 = arith.constant 18 : index
    %c0_11 = arith.constant 0 : index
    %7 = vector.load %arg3[%c2_9, %c18_10, %c0_11] : memref<19x19x128xf32, #tpu.memory_space<vmem>>, vector<16x1x128xf32>
    tpu.vector_store %arg3[%c2_9, %c18_10, %c0_11], %6 {strides = array<i32>} : memref<19x19x128xf32, #tpu.memory_space<vmem>>, vector<16x1x128xf32>,
    %c0_12 = arith.constant 0 : index
    %c0_13 = arith.constant 0 : index
    %c0_14 = arith.constant 0 : index
    %8 = vector.load %arg1[%c0_12, %c0_13, %c0_14] : memref<16x16x128xf32, #tpu.memory_space<vmem>>, vector<16x16x128xf32>
    %c2_15 = arith.constant 2 : index
    %c2_16 = arith.constant 2 : index
    %c0_17 = arith.constant 0 : index
    %9 = vector.load %arg3[%c2_15, %c2_16, %c0_17] : memref<19x19x128xf32, #tpu.memory_space<vmem>>, vector<16x16x128xf32>
    tpu.vector_store %arg3[%c2_15, %c2_16, %c0_17], %8 {strides = array<i32>} : memref<19x19x128xf32, #tpu.memory_space<vmem>>, vector<16x16x128xf32>,
    %c0_18 = arith.constant 0 : index
    %c0_19 = arith.constant 0 : index
    %c0_20 = arith.constant 0 : index
    %10 = vector.load %arg3[%c0_18, %c0_19, %c0_20] : memref<19x19x128xf32, #tpu.memory_space<vmem>>, vector<19x16x128xf32>
    %cst_21 = arith.constant 1.250000e-01 : f32
    %11 = vector.broadcast %cst_21 : f32 to vector<19x16x128xf32>
    %12 = arith.mulf %11, %10 : vector<19x16x128xf32>
    %c0_22 = arith.constant 0 : index
    %c1 = arith.constant 1 : index
    %c0_23 = arith.constant 0 : index
    %13 = vector.load %arg3[%c0_22, %c1, %c0_23] : memref<19x19x128xf32, #tpu.memory_space<vmem>>, vector<19x16x128xf32>
    %cst_24 = arith.constant 3.750000e-01 : f32
    %14 = vector.broadcast %cst_24 : f32 to vector<19x16x128xf32>
    %15 = arith.mulf %14, %13 : vector<19x16x128xf32>
    %16 = arith.addf %12, %15 : vector<19x16x128xf32>
    %c0_25 = arith.constant 0 : index
    %c2_26 = arith.constant 2 : index
    %c0_27 = arith.constant 0 : index
    %17 = vector.load %arg3[%c0_25, %c2_26, %c0_27] : memref<19x19x128xf32, #tpu.memory_space<vmem>>, vector<19x16x128xf32>
    %cst_28 = arith.constant 3.750000e-01 : f32
    %18 = vector.broadcast %cst_28 : f32 to vector<19x16x128xf32>
    %19 = arith.mulf %18, %17 : vector<19x16x128xf32>
    %20 = arith.addf %16, %19 : vector<19x16x128xf32>
    %c0_29 = arith.constant 0 : index
    %c3 = arith.constant 3 : index
    %c0_30 = arith.constant 0 : index
    %21 = vector.load %arg3[%c0_29, %c3, %c0_30] : memref<19x19x128xf32, #tpu.memory_space<vmem>>, vector<19x16x128xf32>
    %cst_31 = arith.constant 1.250000e-01 : f32
    %22 = vector.broadcast %cst_31 : f32 to vector<19x16x128xf32>
    %23 = arith.mulf %22, %21 : vector<19x16x128xf32>
    %24 = arith.addf %20, %23 : vector<19x16x128xf32>
    %c0_32 = arith.constant 0 : index
    %c0_33 = arith.constant 0 : index
    %c0_34 = arith.constant 0 : index
    %25 = vector.load %arg4[%c0_32, %c0_33, %c0_34] : memref<19x16x128xf32, #tpu.memory_space<vmem>>, vector<19x16x128xf32>
    tpu.vector_store %arg4[%c0_32, %c0_33, %c0_34], %24 {strides = array<i32>} : memref<19x16x128xf32, #tpu.memory_space<vmem>>, vector<19x16x128xf32>,
    %c0_35 = arith.constant 0 : index
    %c0_36 = arith.constant 0 : index
    %c0_37 = arith.constant 0 : index
    %26 = vector.load %arg4[%c0_35, %c0_36, %c0_37] : memref<19x16x128xf32, #tpu.memory_space<vmem>>, vector<16x16x128xf32>
    %cst_38 = arith.constant 1.250000e-01 : f32
    %27 = vector.broadcast %cst_38 : f32 to vector<16x16x128xf32>
    %28 = arith.mulf %27, %26 : vector<16x16x128xf32>
    %c1_39 = arith.constant 1 : index
    %c0_40 = arith.constant 0 : index
    %c0_41 = arith.constant 0 : index
    %29 = vector.load %arg4[%c1_39, %c0_40, %c0_41] : memref<19x16x128xf32, #tpu.memory_space<vmem>>, vector<16x16x128xf32>
    %cst_42 = arith.constant 3.750000e-01 : f32
    %30 = vector.broadcast %cst_42 : f32 to vector<16x16x128xf32>
    %31 = arith.mulf %30, %29 : vector<16x16x128xf32>
    %32 = arith.addf %28, %31 : vector<16x16x128xf32>
    %c2_43 = arith.constant 2 : index
    %c0_44 = arith.constant 0 : index
    %c0_45 = arith.constant 0 : index
    %33 = vector.load %arg4[%c2_43, %c0_44, %c0_45] : memref<19x16x128xf32, #tpu.memory_space<vmem>>, vector<16x16x128xf32>
    %cst_46 = arith.constant 3.750000e-01 : f32
    %34 = vector.broadcast %cst_46 : f32 to vector<16x16x128xf32>
    %35 = arith.mulf %34, %33 : vector<16x16x128xf32>
    %36 = arith.addf %32, %35 : vector<16x16x128xf32>
    %c3_47 = arith.constant 3 : index
    %c0_48 = arith.constant 0 : index
    %c0_49 = arith.constant 0 : index
    %37 = vector.load %arg4[%c3_47, %c0_48, %c0_49] : memref<19x16x128xf32, #tpu.memory_space<vmem>>, vector<16x16x128xf32>
    %cst_50 = arith.constant 1.250000e-01 : f32
    %38 = vector.broadcast %cst_50 : f32 to vector<16x16x128xf32>
    %39 = arith.mulf %38, %37 : vector<16x16x128xf32>
    %40 = arith.addf %36, %39 : vector<16x16x128xf32>
    %c0_51 = arith.constant 0 : index
    %c0_52 = arith.constant 0 : index
    %c0_53 = arith.constant 0 : index
    %41 = vector.load %arg2[%c0_51, %c0_52, %c0_53] : memref<16x16x128xf32, #tpu.memory_space<vmem>>, vector<16x16x128xf32>
    tpu.vector_store %arg2[%c0_51, %c0_52, %c0_53], %40 {strides = array<i32>} : memref<16x16x128xf32, #tpu.memory_space<vmem>>, vector<16x16x128xf32>,
    return
  }
  func.func @transform_0(%arg0: i32) -> (i32, i32, i32) {
    %c0_i32 = arith.constant 0 : i32
    %c0_i32_0 = arith.constant 0 : i32
    %c0_i32_1 = arith.constant 0 : i32
    return %c0_i32, %c0_i32_0, %arg0 : i32, i32, i32
  }
  func.func @transform_1(%arg0: i32) -> (i32, i32, i32) {
    %c0_i32 = arith.constant 0 : i32
    %c0_i32_0 = arith.constant 0 : i32
    %c0_i32_1 = arith.constant 0 : i32
    return %c0_i32, %c0_i32_0, %arg0 : i32, i32, i32
  }
}

</mosaic_0001>

<bundles_post_ra>
// kernel: tpu_custom_call.1
= control target key start
LH: loop header
LB: loop body
LE: loop exit
PB: predicated region body
PF: predicated region fallthrough
CT: control target
= control target key end

     0   :  { %6 = vsyncpa [#allocation5], 0  ;;  %s1210_s0 = inlined_call_operand.hbm [shape: f32[16,16,128], index: 0, kind: input, shape index: {}]   ;;  %s1211_s1 = inlined_call_operand.hbm [shape: f32[16,16,128], index: 1, kind: output, shape index: {}]  }
   0x1   :  { %7 = vsyncpa [#allocation6], 0  ;;  %s1044_s6 = smov [#allocation4]   ;;  %s996_s10 = scalar_lea.hbm %s1210_s0, 4096 }
   0x2   :  { %s13_s7 = sshll.u32 %s1044_s6, 4  ;;  %p997_p0 = scmp.ne.s32.totalorder %s1210_s0, %s996_s10  ;;  %s14_s7 = int_to_ptr.vmem [resolvable:$true] %s13_s7 }
   0x3   :  { %p1000_p1 = scmp.lt.u32.totalorder %s996_s10, %s1210_s0 }
   0x5   :  { %p1002_p2 = pnand %p1000_p1, %p997_p0 }
   0x7   :  { %1005 = shalt.err (!%p1002_p2)
}
   0x8   :  { %s1006_s15 = scalar_lea.vmem %s14_s7, 4096  ;;  %p1011_p4 = scmp.lt.s32.totalorder %s14_s7, %s14_s7 }
   0x9   :  { %p1007_p3 = scmp.ne.s32.totalorder %s14_s7, %s1006_s15  ;;  %p1012_p5 = scmp.lt.s32.totalorder %s1006_s15, %s1006_s15 }
   0xb   :  { %p1013_p6 = por %p1012_p5, %p1011_p4 }
   0xd   :  { %p1014_p7 = pnand %p1013_p6, %p1007_p3 }
   0xf   :  { %1017 = shalt.err (!%p1014_p7)
}
  0x10   :  { %s1045_s16 = smov 128   ;;  %s1046_s17 = smov 8  }
  0x11   :  { %19 = dma.hbm_to_vmem [thread:$0]  %s1210_s0, 4096, %s14_s7, [#allocation5], %s1045_s16, %s1045_s16, %s1046_s17  }
  0x12   :  { %1040 = dma.done.wait [#allocation5], 4096  }
  0x13   :  { %1041 = vsyncadd [#allocation5], 4294963200  ;;  %v1047_v0 = vmov 0.0   ;;  %v66_v1 = vld [vmem:[#allocation4] sm:$0xff]  ;;  %v67_v2 = vld [vmem:[#allocation4 + $0x8] sm:$0xff]  ;;  %s1048_s0 = smov [#allocation7]  }
  0x14   :  { %23 = vst [vmem:[#allocation2] sm:$0xff] %v1047_v0  ;;  %24 = vst [vmem:[#allocation2 + $0x8] sm:$0xff] %v1047_v0  ;;  %v68_v3 = vld [vmem:[#allocation4 + $0x10] sm:$0xff]  ;;  %v69_v4 = vld [vmem:[#allocation4 + $0x18] sm:$0xff]  ;;  %v1074_v10 = vmul.f32 0.375, %v66_v1  ;;  %v1078_v15 = vmul.f32 0.375, %v67_v2 }
  0x15   :  { %25 = vst [vmem:[#allocation2 + $0x10] sm:$0x7] %v1047_v0  ;;  %26 = vst [vmem:[#allocation2 + $0x18] sm:$0xff] %v1047_v0  ;;  %v70_v5 = vld [vmem:[#allocation4 + $0x20] sm:$0xff]  ;;  %v71_v6 = vld [vmem:[#allocation4 + $0x28] sm:$0xff]  ;;  %v1076_v14 = vmul.f32 0.375, %v68_v3 }
  0x16   :  { %27 = vst [vmem:[#allocation2 + $0x20] sm:$0xff] %v1047_v0  ;;  %28 = vst [vmem:[#allocation2 + $0x28] sm:$0x7] %v1047_v0  ;;  %v72_v7 = vld [vmem:[#allocation4 + $0x30] sm:$0xff]  ;;  %v73_v8 = vld [vmem:[#allocation4 + $0x38] sm:$0xff]  ;;  %v1080_v16 = vmul.f32 0.375, %v69_v4 }
  0x17   :  { %30 = vst [vmem:[#allocation2 + $0x1b0] sm:$0xff] %v1047_v0  ;;  %31 = vst [vmem:[#allocation2 + $0x1b8] sm:$0xff] %v1047_v0  ;;  %v74_v9 = vld [vmem:[#allocation4 + $0x40] sm:$0xff]  ;;  %v75_v11 = vld [vmem:[#allocation4 + $0x48] sm:$0xff]  ;;  %v1082_v20 = vmul.f32 0.375, %v70_v5  ;;  %v1084_v21 = vmul.f32 0.375, %v71_v6 }
  0x18   :  { %32 = vst [vmem:[#allocation2 + $0x1c0] sm:$0x7] %v1047_v0  ;;  %34 = vst [vmem:[#allocation2 + $0x30] sm:$0x3] %v1047_v0  ;;  %v76_v12 = vld [vmem:[#allocation4 + $0x50] sm:$0xff]  ;;  %v77_v13 = vld [vmem:[#allocation4 + $0x58] sm:$0xff] }
  0x19   :  { %35 = vst [vmem:[#allocation2 + $0x48] sm:$0x3] %v1047_v0  ;;  %36 = vst [vmem:[#allocation2 + $0x60] sm:$0x3] %v1047_v0  ;;  %v78_v17 = vld [vmem:[#allocation4 + $0x60] sm:$0xff]  ;;  %v79_v18 = vld [vmem:[#allocation4 + $0x68] sm:$0xff] }
  0x1a   :  { %37 = vst [vmem:[#allocation2 + $0x78] sm:$0x3] %v1047_v0  ;;  %38 = vst [vmem:[#allocation2 + $0x90] sm:$0x3] %v1047_v0  ;;  %v80_v19 = vld [vmem:[#allocation4 + $0x70] sm:$0xff]  ;;  %v1086_v22 = vmul.f32 0.375, %v72_v7 }
  0x1b   :  { %39 = vst [vmem:[#allocation2 + $0xa8] sm:$0x3] %v1047_v0  ;;  %40 = vst [vmem:[#allocation2 + $0xc0] sm:$0x3] %v1047_v0  ;;  %v81_v23 = vld [vmem:[#allocation4 + $0x78] sm:$0xff]  ;;  %v82_v24 = vld [vmem:[#allocation4 + $0x80] sm:$0xff] }
  0x1c   :  { %41 = vst [vmem:[#allocation2 + $0xd8] sm:$0x3] %v1047_v0  ;;  %42 = vst [vmem:[#allocation2 + $0xf0] sm:$0x3] %v1047_v0  ;;  %v83_v25 = vld [vmem:[#allocation4 + $0x88] sm:$0xff]  ;;  %v1088_v26 = vmul.f32 0.375, %v73_v8 }
  0x1d   :  { %43 = vst [vmem:[#allocation2 + $0x108] sm:$0x3] %v1047_v0  ;;  %44 = vst [vmem:[#allocation2 + $0x120] sm:$0x3] %v1047_v0  ;;  %v1090_v27 = vmul.f32 0.375, %v74_v9  ;;  %v1092_v28 = vmul.f32 0.375, %v75_v11 }
  0x1e   :  { %45 = vst [vmem:[#allocation2 + $0x138] sm:$0x3] %v1047_v0  ;;  %46 = vst [vmem:[#allocation2 + $0x150] sm:$0x3] %v1047_v0  ;;  %v84_v29 = vld [vmem:[#allocation4 + $0x90] sm:$0xff]  ;;  %v85_v30 = vld [vmem:[#allocation4 + $0x98] sm:$0xff] }
  0x1f   :  { %47 = vst [vmem:[#allocation2 + $0x168] sm:$0x3] %v1047_v0  ;;  %48 = vst [vmem:[#allocation2 + $0x180] sm:$0x3] %v1047_v0  ;;  %v86_v31 = vld [vmem:[#allocation4 + $0xa0] sm:$0xff]  ;;  %v1094_v32 = vmul.f32 0.375, %v76_v12 }
  0x20   :  { %49 = vst [vmem:[#allocation2 + $0x198] sm:$0x3] %v1047_v0  ;;  %50 = vst [vmem:[#allocation2 + $0x42] sm:$0x1] %v1047_v0  ;;  %v1096_v33 = vmul.f32 0.375, %v77_v13  ;;  %v1098_v34 = vmul.f32 0.375, %v78_v17 }
  0x21   :  { %51 = vst [vmem:[#allocation2 + $0x5a] sm:$0x1] %v1047_v0  ;;  %52 = vst [vmem:[#allocation2 + $0x72] sm:$0x1] %v1047_v0  ;;  %v87_v35 = vld [vmem:[#allocation4 + $0xa8] sm:$0xff]  ;;  %v88_v36 = vld [vmem:[#allocation4 + $0xb0] sm:$0xff] }
  0x22   :  { %53 = vst [vmem:[#allocation2 + $0x8a] sm:$0x1] %v1047_v0  ;;  %54 = vst [vmem:[#allocation2 + $0xa2] sm:$0x1] %v1047_v0  ;;  %v89_v37 = vld [vmem:[#allocation4 + $0xb8] sm:$0xff]  ;;  %v1100_v38 = vmul.f32 0.375, %v79_v18 }
  0x23   :  { %55 = vst [vmem:[#allocation2 + $0xba] sm:$0x1] %v1047_v0  ;;  %56 = vst [vmem:[#allocation2 + $0xd2] sm:$0x1] %v1047_v0  ;;  %v1102_v39 = vmul.f32 0.375, %v80_v19  ;;  %v1104_v40 = vmul.f32 0.375, %v81_v23 }
  0x24   :  { %57 = vst [vmem:[#allocation2 + $0xea] sm:$0x1] %v1047_v0  ;;  %58 = vst [vmem:[#allocation2 + $0x102] sm:$0x1] %v1047_v0  ;;  %v90_v41 = vld [vmem:[#allocation4 + $0xc0] sm:$0xff]  ;;  %v91_v42 = vld [vmem:[#allocation4 + $0xc8] sm:$0xff] }
  0x25   :  { %59 = vst [vmem:[#allocation2 + $0x11a] sm:$0x1] %v1047_v0  ;;  %60 = vst [vmem:[#allocation2 + $0x132] sm:$0x1] %v1047_v0  ;;  %v92_v43 = vld [vmem:[#allocation4 + $0xd0] sm:$0xff]  ;;  %v1106_v44 = vmul.f32 0.375, %v82_v24 }
  0x26   :  { %61 = vst [vmem:[#allocation2 + $0x14a] sm:$0x1] %v1047_v0  ;;  %62 = vst [vmem:[#allocation2 + $0x162] sm:$0x1] %v1047_v0  ;;  %v1108_v45 = vmul.f32 0.375, %v83_v25  ;;  %v1110_v46 = vmul.f32 0.375, %v84_v29 }
  0x27   :  { %63 = vst [vmem:[#allocation2 + $0x17a] sm:$0x1] %v1047_v0  ;;  %64 = vst [vmem:[#allocation2 + $0x192] sm:$0x1] %v1047_v0  ;;  %v93_v47 = vld [vmem:[#allocation4 + $0xd8] sm:$0xff]  ;;  %v94_v48 = vld [vmem:[#allocation4 + $0xe0] sm:$0xff] }
  0x28   :  { %65 = vst [vmem:[#allocation2 + $0x1aa] sm:$0x1] %v1047_v0  ;;  %98 = vst [vmem:[#allocation2 + $0x32] sm:$0xff] %v66_v1  ;;  %v95_v49 = vld [vmem:[#allocation4 + $0xe8] sm:$0xff]  ;;  %v1112_v50 = vmul.f32 0.375, %v85_v30  ;;  %v1114_v51 = vmul.f32 0.375, %v86_v31 }
  0x29   :  { %99 = vst [vmem:[#allocation2 + $0x3a] sm:$0xff] %v67_v2  ;;  %100 = vst [vmem:[#allocation2 + $0x4a] sm:$0xff] %v68_v3  ;;  %v1116_v52 = vmul.f32 0.375, %v87_v35  ;;  %v96_v53 = vld [vmem:[#allocation4 + $0xf0] sm:$0xff]  ;;  %v97_v54 = vld [vmem:[#allocation4 + $0xf8] sm:$0xff]  ;;  %v1118_v56 = vmul.f32 0.375, %v88_v36 }
  0x2a   :  { %101 = vst [vmem:[#allocation2 + $0x52] sm:$0xff] %v69_v4  ;;  %102 = vst [vmem:[#allocation2 + $0x62] sm:$0xff] %v70_v5  ;;  %v1120_v57 = vmul.f32 0.375, %v89_v37  ;;  %v1122_v58 = vmul.f32 0.375, %v90_v41  ;;  %v206_v61 = vld [vmem:[#allocation2 + $0x1] sm:$0xff]  ;;  %v208_v62 = vld [vmem:[#allocation2 + $0x19] sm:$0xff] }
  0x2b   :  { %103 = vst [vmem:[#allocation2 + $0x6a] sm:$0xff] %v71_v6  ;;  %104 = vst [vmem:[#allocation2 + $0x7a] sm:$0xff] %v72_v7  ;;  %v1124_v63 = vmul.f32 0.375, %v91_v42  ;;  %v1126_v0 = vmul.f32 0.375, %v92_v43  ;;  %v244_v4 = vmul.f32 0.375, %v206_v61  ;;  %v246_v5 = vmul.f32 0.375, %v208_v62 }
  0x2c   :  { %105 = vst [vmem:[#allocation2 + $0x82] sm:$0xff] %v73_v8  ;;  %106 = vst [vmem:[#allocation2 + $0x92] sm:$0xff] %v74_v9  ;;  %v320_v6 = vld [vmem:[#allocation2 + $0x2] sm:$0xff]  ;;  %v322_v9 = vld [vmem:[#allocation2 + $0x1a] sm:$0xff]  ;;  %s978_s20 = sshll.u32 %s1048_s0, 4  ;;  %s979_s20 = int_to_ptr.vmem [resolvable:$true] %s978_s20 }
  0x2d   :  { %107 = vst [vmem:[#allocation2 + $0x9a] sm:$0xff] %v75_v11  ;;  %108 = vst [vmem:[#allocation2 + $0xaa] sm:$0xff] %v76_v12  ;;  %v358_v11 = vmul.f32 0.375, %v320_v6  ;;  %v434_v12 = vld [vmem:[#allocation2 + $0x3] sm:$0xff]  ;;  %s1018_s21 = scalar_lea.vmem %s979_s20, 4096  ;;  %p1023_p9 = scmp.lt.s32.totalorder %s979_s20, %s979_s20 }
  0x2e   :  { %109 = vst [vmem:[#allocation2 + $0xb2] sm:$0xff] %v77_v13  ;;  %110 = vst [vmem:[#allocation2 + $0xc2] sm:$0xff] %v78_v17  ;;  %v436_v13 = vld [vmem:[#allocation2 + $0x1b] sm:$0xff]  ;;  %v360_v17 = vmul.f32 0.375, %v322_v9  ;;  %p1019_p8 = scmp.ne.s32.totalorder %s979_s20, %s1018_s21  ;;  %p1024_p10 = scmp.lt.s32.totalorder %s1018_s21, %s1018_s21 }
  0x2f   :  { %111 = vst [vmem:[#allocation2 + $0xca] sm:$0xff] %v79_v18  ;;  %112 = vst [vmem:[#allocation2 + $0xda] sm:$0xff] %v80_v19  ;;  %v134_v55 = vld [vmem:[#allocation2 + $0x30] sm:$0xff] }
  0x30   :  { %113 = vst [vmem:[#allocation2 + $0xe2] sm:$0xff] %v81_v23  ;;  %114 = vst [vmem:[#allocation2 + $0xf2] sm:$0xff] %v82_v24  ;;  %v136_v59 = vld [vmem:[#allocation2 + $0x48] sm:$0xff]  ;;  %v172_v60 = vmul.f32 0.125, %v134_v55  ;;  %v210_v2 = vld [vmem:[#allocation2 + $0x31] sm:$0xff]  ;;  %v472_v23 = vmul.f32 0.125, %v434_v12  ;;  %p1025_p11 = por %p1024_p10, %p1023_p9 }
  0x31   :  { %115 = vst [vmem:[#allocation2 + $0xfa] sm:$0xff] %v83_v25  ;;  %116 = vst [vmem:[#allocation2 + $0x10a] sm:$0xff] %v84_v29  ;;  %v174_v1 = vmul.f32 0.125, %v136_v59  ;;  %v212_v3 = vld [vmem:[#allocation2 + $0x49] sm:$0xff]  ;;  %v248_v7 = vmul.f32 0.375, %v210_v2  ;;  %v438_v18 = vld [vmem:[#allocation2 + $0x33] sm:$0xff] }
  0x32   :  { %117 = vst [vmem:[#allocation2 + $0x112] sm:$0xff] %v85_v30  ;;  %118 = vst [vmem:[#allocation2 + $0x122] sm:$0xff] %v86_v31  ;;  %v250_v8 = vmul.f32 0.375, %v212_v3  ;;  %v440_v19 = vld [vmem:[#allocation2 + $0x4b] sm:$0xff]  ;;  %v135_v24 = vld [vmem:[#allocation2 + $0x38] sm:$0xff]  ;;  %v474_v30 = vmul.f32 0.125, %v436_v13  ;;  %p1026_p12 = pnand %p1025_p11, %p1019_p8 }
  0x33   :  { %119 = vst [vmem:[#allocation2 + $0x12a] sm:$0xff] %v87_v35  ;;  %120 = vst [vmem:[#allocation2 + $0x13a] sm:$0xff] %v88_v36  ;;  %v286_v25 = vadd.f32 %v248_v7, %v172_v60  ;;  %v476_v31 = vmul.f32 0.125, %v438_v18  ;;  %v137_v35 = vld [vmem:[#allocation2 + $0x50] sm:$0xff]  ;;  %v437_v12 = vld [vmem:[#allocation2 + $0x23] sm:$0xff] }
  0x34   :  { %121 = vst [vmem:[#allocation2 + $0x142] sm:$0xff] %v89_v37  ;;  %122 = vst [vmem:[#allocation2 + $0x152] sm:$0xff] %v90_v41  ;;  %v288_v29 = vadd.f32 %v250_v8, %v174_v1  ;;  %v207_v36 = vld [vmem:[#allocation2 + $0x9] sm:$0xff]  ;;  %v209_v37 = vld [vmem:[#allocation2 + $0x21] sm:$0xff]  ;;  %v396_v41 = vadd.f32 %v358_v11, %v244_v4  ;;  %v175_v55 = vmul.f32 0.125, %v137_v35 }
  0x35   :  { %123 = vst [vmem:[#allocation2 + $0x15a] sm:$0xff] %v91_v42  ;;  %124 = vst [vmem:[#allocation2 + $0x16a] sm:$0xff] %v92_v43  ;;  %v398_v42 = vadd.f32 %v360_v17, %v246_v5  ;;  %v478_v43 = vmul.f32 0.125, %v440_v19  ;;  %v245_v59 = vmul.f32 0.375, %v207_v36  ;;  %v247_v62 = vmul.f32 0.375, %v209_v37  ;;  %v321_v2 = vld [vmem:[#allocation2 + $0xa] sm:$0xff] }
  0x36   :  { %125 = vst [vmem:[#allocation2 + $0x172] sm:$0xff] %v93_v47  ;;  %126 = vst [vmem:[#allocation2 + $0x182] sm:$0xff] %v94_v48  ;;  %v173_v47 = vmul.f32 0.125, %v135_v24  ;;  %v211_v48 = vld [vmem:[#allocation2 + $0x39] sm:$0xff]  ;;  %v510_v61 = vadd.f32 %v472_v23, %v396_v41  ;;  %v323_v5 = vld [vmem:[#allocation2 + $0x22] sm:$0xff]  ;;  %v359_v18 = vmul.f32 0.375, %v321_v2 }
  0x37   :  { %127 = vst [vmem:[#allocation2 + $0x18a] sm:$0xff] %v95_v49  ;;  %128 = vst [vmem:[#allocation2 + $0x19a] sm:$0xff] %v96_v53  ;;  %v213_v49 = vld [vmem:[#allocation2 + $0x51] sm:$0xff]  ;;  %v400_v53 = vadd.f32 %v1074_v10, %v286_v25  ;;  %v512_v60 = vadd.f32 %v474_v30, %v398_v42  ;;  %v249_v1 = vmul.f32 0.375, %v211_v48  ;;  %v439_v10 = vld [vmem:[#allocation2 + $0x3b] sm:$0xff]  ;;  %v361_v25 = vmul.f32 0.375, %v323_v5 }
  0x38   :  { %129 = vst [vmem:[#allocation2 + $0x1a2] sm:$0xff] %v97_v54  ;;  %v402_v54 = vadd.f32 %v1076_v14, %v288_v29  ;;  %v251_v4 = vmul.f32 0.375, %v213_v49  ;;  %v435_v7 = vld [vmem:[#allocation2 + $0xb] sm:$0xff]  ;;  %v618_v8 = vmul.f32 0.125, %v510_v61  ;;  %v441_v19 = vld [vmem:[#allocation2 + $0x53] sm:$0xff]  ;;  %v138_v23 = vld [vmem:[#allocation2 + $0x60] sm:$0xff]  ;;  %v397_v36 = vadd.f32 %v359_v18, %v245_v59 }
  0x39   :  { %v1130_v3 = vadd.f32 %v476_v31, %v400_v53  ;;  %v683_v9 = vmul.f32 0.375, %v512_v60  ;;  %v287_v11 = vadd.f32 %v249_v1, %v173_v47  ;;  %v473_v30 = vmul.f32 0.125, %v435_v7  ;;  %v214_v31 = vld [vmem:[#allocation2 + $0x61] sm:$0xff]  ;;  %v215_v7 = vld [vmem:[#allocation2 + $0x69] sm:$0xff] }
  0x3a   :  { %v516_v6 = vadd.f32 %v478_v43, %v402_v54  ;;  %v289_v17 = vadd.f32 %v251_v4, %v175_v55  ;;  %v442_v35 = vld [vmem:[#allocation2 + $0x63] sm:$0xff]  ;;  %v475_v41 = vmul.f32 0.125, %v437_v12  ;;  %v477_v42 = vmul.f32 0.125, %v439_v10  ;;  %v443_v59 = vld [vmem:[#allocation2 + $0x6b] sm:$0xff]  ;;  %v140_v12 = vld [vmem:[#allocation2 + $0x78] sm:$0xff] }
  0x3b   :  { %v685_v14 = vmul.f32 0.375, %v1130_v3  ;;  %v715_v24 = vadd.f32 %v683_v9, %v618_v8  ;;  %v401_v29 = vadd.f32 %v1078_v15, %v287_v11  ;;  %v399_v47 = vadd.f32 %v361_v25, %v247_v62  ;;  %v139_v1 = vld [vmem:[#allocation2 + $0x68] sm:$0xff] }
  0x3c   :  { %v1132_v13 = vmul.f32 0.125, %v516_v6  ;;  %v403_v37 = vadd.f32 %v1080_v16, %v289_v17  ;;  %v479_v48 = vmul.f32 0.125, %v441_v19  ;;  %v176_v49 = vmul.f32 0.125, %v138_v23  ;;  %v216_v19 = vld [vmem:[#allocation2 + $0x79] sm:$0xff] }
  0x3d   :  { %v812_v43 = vadd.f32 %v715_v24, %v685_v14  ;;  %v511_v53 = vadd.f32 %v473_v30, %v397_v36  ;;  %v515_v54 = vadd.f32 %v477_v42, %v401_v29  ;;  %v252_v55 = vmul.f32 0.375, %v214_v31  ;;  %v141_v30 = vld [vmem:[#allocation2 + $0x80] sm:$0xff] }
  0x3e   :  { %v480_v61 = vmul.f32 0.125, %v442_v35  ;;  %v513_v15 = vadd.f32 %v475_v41, %v399_v47  ;;  %v517_v4 = vadd.f32 %v479_v48, %v403_v37  ;;  %v620_v5 = vmul.f32 0.125, %v512_v60  ;;  %v444_v60 = vld [vmem:[#allocation2 + $0x7b] sm:$0xff] }
  0x3f   :  { %v909_v2 = vadd.f32 %v812_v43, %v1132_v13  ;;  %v619_v8 = vmul.f32 0.125, %v511_v53  ;;  %v686_v16 = vmul.f32 0.375, %v515_v54  ;;  %v290_v9 = vadd.f32 %v252_v55, %v176_v49  ;;  %v217_v47 = vld [vmem:[#allocation2 + $0x81] sm:$0xff] }
  0x40   :  { %v687_v11 = vmul.f32 0.375, %v516_v6  ;;  %v1138_v62 = vmul.f32 0.125, %v517_v4  ;;  %v684_v10 = vmul.f32 0.375, %v513_v15  ;;  %v717_v17 = vadd.f32 %v685_v14, %v620_v5  ;;  %v142_v5 = vld [vmem:[#allocation2 + $0x90] sm:$0xff] }
  0x41   :  { %941 = vst [vmem:[#allocation7] sm:$0xff] %v909_v2  ;;  %v177_v18 = vmul.f32 0.125, %v139_v1  ;;  %v404_v23 = vadd.f32 %v1082_v20, %v290_v9  ;;  %v253_v24 = vmul.f32 0.375, %v215_v7  ;;  %v481_v25 = vmul.f32 0.125, %v443_v59  ;;  %v445_v20 = vld [vmem:[#allocation2 + $0x83] sm:$0xff] }
  0x42   :  { %v621_v29 = vmul.f32 0.125, %v513_v15  ;;  %v716_v31 = vadd.f32 %v684_v10, %v619_v8  ;;  %v814_v35 = vadd.f32 %v717_v17, %v687_v11  ;;  %v688_v36 = vmul.f32 0.375, %v517_v4  ;;  %v218_v8 = vld [vmem:[#allocation2 + $0x91] sm:$0xff] }
  0x43   :  { %v178_v37 = vmul.f32 0.125, %v140_v12  ;;  %v518_v6 = vadd.f32 %v480_v61, %v404_v23  ;;  %v291_v41 = vadd.f32 %v253_v24, %v177_v18  ;;  %v254_v43 = vmul.f32 0.375, %v216_v19  ;;  %v446_v10 = vld [vmem:[#allocation2 + $0x93] sm:$0xff] }
  0x44   :  { %v718_v42 = vadd.f32 %v686_v16, %v621_v29  ;;  %v813_v48 = vadd.f32 %v716_v31, %v686_v16  ;;  %v482_v14 = vmul.f32 0.125, %v444_v60  ;;  %v622_v49 = vmul.f32 0.125, %v1130_v3 }
  0x45   :  { %v179_v53 = vmul.f32 0.125, %v141_v30  ;;  %v1142_v55 = vmul.f32 0.125, %v518_v6  ;;  %v405_v1 = vadd.f32 %v1084_v21, %v291_v41  ;;  %v292_v15 = vadd.f32 %v254_v43, %v178_v37  ;;  %v219_v30 = vld [vmem:[#allocation2 + $0x99] sm:$0xff] }
  0x46   :  { %v815_v2 = vadd.f32 %v718_v42, %v688_v36  ;;  %v910_v4 = vadd.f32 %v813_v48, %v1138_v62  ;;  %v689_v61 = vmul.f32 0.375, %v518_v6  ;;  %v719_v7 = vadd.f32 %v687_v11, %v622_v49  ;;  %v143_v11 = vld [vmem:[#allocation2 + $0x98] sm:$0xff] }
  0x47   :  { %v255_v59 = vmul.f32 0.375, %v217_v47  ;;  %v911_v16 = vadd.f32 %v814_v35, %v1142_v55  ;;  %v519_v9 = vadd.f32 %v481_v25, %v405_v1  ;;  %v406_v3 = vadd.f32 %v1086_v22, %v292_v15  ;;  %v447_v37 = vld [vmem:[#allocation2 + $0x9b] sm:$0xff] }
  0x48   :  { %v483_v12 = vmul.f32 0.125, %v445_v20  ;;  %942 = vst [vmem:[#allocation7 + $0x8] sm:$0xff] %v910_v4  ;;  %v816_v17 = vadd.f32 %v719_v7, %v689_v61  ;;  %v623_v21 = vmul.f32 0.125, %v515_v54  ;;  %v180_v19 = vmul.f32 0.125, %v142_v5  ;;  %v448_v20 = vld [vmem:[#allocation2 + $0xab] sm:$0xff] }
  0x49   :  { %v293_v18 = vadd.f32 %v255_v59, %v179_v53  ;;  %943 = vst [vmem:[#allocation7 + $0x10] sm:$0xff] %v911_v16  ;;  %v627_v23 = vmul.f32 0.125, %v519_v9  ;;  %v520_v24 = vadd.f32 %v482_v14, %v406_v3  ;;  %v690_v29 = vmul.f32 0.375, %v519_v9  ;;  %v144_v14 = vld [vmem:[#allocation2 + $0xa8] sm:$0xff]  ;;  %v221_v9 = vld [vmem:[#allocation2 + $0xb1] sm:$0xff] }
  0x4a   :  { %v256_v60 = vmul.f32 0.375, %v218_v8  ;;  %v720_v35 = vadd.f32 %v688_v36, %v623_v21  ;;  %v484_v25 = vmul.f32 0.125, %v446_v10  ;;  %v721_v22 = vadd.f32 %v689_v61, %v1132_v13  ;;  %v220_v53 = vld [vmem:[#allocation2 + $0xa9] sm:$0xff]  ;;  %v449_v3 = vld [vmem:[#allocation2 + $0xb3] sm:$0xff] }
  0x4b   :  { %v407_v31 = vadd.f32 %v1088_v26, %v293_v18  ;;  %v912_v6 = vadd.f32 %v815_v2, %v627_v23  ;;  %v628_v41 = vmul.f32 0.125, %v520_v24  ;;  %v691_v43 = vmul.f32 0.375, %v520_v24  ;;  %v145_v61 = vld [vmem:[#allocation2 + $0xb0] sm:$0xff]  ;;  %v146_v18 = vld [vmem:[#allocation2 + $0xc0] sm:$0xff] }
  0x4c   :  { %v294_v42 = vadd.f32 %v256_v60, %v180_v19  ;;  %v817_v47 = vadd.f32 %v720_v35, %v690_v29  ;;  %v181_v48 = vmul.f32 0.125, %v143_v11  ;;  %v257_v49 = vmul.f32 0.375, %v219_v30  ;;  %v450_v35 = vld [vmem:[#allocation2 + $0xc3] sm:$0xff] }
  0x4d   :  { %v521_v54 = vadd.f32 %v483_v12, %v407_v31  ;;  %944 = vst [vmem:[#allocation7 + $0x18] sm:$0xff] %v912_v6  ;;  %v913_v1 = vadd.f32 %v816_v17, %v628_v41  ;;  %v818_v36 = vadd.f32 %v721_v22, %v691_v43  ;;  %v485_v15 = vmul.f32 0.125, %v447_v37 }
  0x4e   :  { %v408_v26 = vadd.f32 %v1090_v27, %v294_v42  ;;  %v295_v13 = vadd.f32 %v257_v49, %v181_v48  ;;  %v722_v2 = vadd.f32 %v690_v29, %v1138_v62  ;;  %v182_v59 = vmul.f32 0.125, %v144_v14  ;;  %v222_v62 = vld [vmem:[#allocation2 + $0xc1] sm:$0xff]  ;;  %v451_v48 = vld [vmem:[#allocation2 + $0xcb] sm:$0xff] }
  0x4f   :  { %v629_v5 = vmul.f32 0.125, %v521_v54  ;;  %v692_v4 = vmul.f32 0.375, %v521_v54  ;;  %945 = vst [vmem:[#allocation7 + $0x20] sm:$0xff] %v913_v1  ;;  %v258_v8 = vmul.f32 0.375, %v220_v53  ;;  %v486_v16 = vmul.f32 0.125, %v448_v20  ;;  %v148_v1 = vld [vmem:[#allocation2 + $0xd8] sm:$0xff] }
  0x50   :  { %v522_v7 = vadd.f32 %v484_v25, %v408_v26  ;;  %v409_v10 = vadd.f32 %v1092_v28, %v295_v13  ;;  %v723_v27 = vadd.f32 %v691_v43, %v1142_v55  ;;  %v183_v60 = vmul.f32 0.125, %v145_v61  ;;  %v147_v25 = vld [vmem:[#allocation2 + $0xc8] sm:$0xff] }
  0x51   :  { %v914_v12 = vadd.f32 %v817_v47, %v629_v5  ;;  %v819_v17 = vadd.f32 %v722_v2, %v692_v4  ;;  %v296_v19 = vadd.f32 %v258_v8, %v182_v59  ;;  %v259_v11 = vmul.f32 0.375, %v221_v9  ;;  %v223_v47 = vld [vmem:[#allocation2 + $0xc9] sm:$0xff] }
  0x52   :  { %v630_v21 = vmul.f32 0.125, %v522_v7  ;;  %v693_v24 = vmul.f32 0.375, %v522_v7  ;;  %v523_v29 = vadd.f32 %v485_v15, %v409_v10  ;;  %v487_v30 = vmul.f32 0.125, %v449_v3  ;;  %v452_v7 = vld [vmem:[#allocation2 + $0xdb] sm:$0xff] }
  0x53   :  { %946 = vst [vmem:[#allocation7 + $0x28] sm:$0xff] %v914_v12  ;;  %v724_v31 = vadd.f32 %v692_v4, %v627_v23  ;;  %v410_v37 = vadd.f32 %v1094_v32, %v296_v19  ;;  %v184_v6 = vmul.f32 0.125, %v146_v18  ;;  %v297_v55 = vadd.f32 %v259_v11, %v183_v60  ;;  %v224_v32 = vld [vmem:[#allocation2 + $0xd9] sm:$0xff]  ;;  %v453_v60 = vld [vmem:[#allocation2 + $0xe3] sm:$0xff] }
  0x54   :  { %v915_v22 = vadd.f32 %v818_v36, %v630_v21  ;;  %v820_v28 = vadd.f32 %v723_v27, %v693_v24  ;;  %v631_v42 = vmul.f32 0.125, %v523_v29  ;;  %v694_v43 = vmul.f32 0.375, %v523_v29 }
  0x55   :  { %v260_v54 = vmul.f32 0.375, %v222_v62  ;;  %v524_v49 = vadd.f32 %v486_v16, %v410_v37  ;;  %v488_v14 = vmul.f32 0.125, %v450_v35  ;;  %v725_v53 = vadd.f32 %v693_v24, %v628_v41  ;;  %v149_v41 = vld [vmem:[#allocation2 + $0xe0] sm:$0xff] }
  0x56   :  { %947 = vst [vmem:[#allocation7 + $0x30] sm:$0xff] %v915_v22  ;;  %v185_v20 = vmul.f32 0.125, %v147_v25  ;;  %v916_v23 = vadd.f32 %v819_v17, %v631_v42  ;;  %v411_v26 = vadd.f32 %v1096_v33, %v297_v55  ;;  %v821_v36 = vadd.f32 %v724_v31, %v694_v43  ;;  %v225_v24 = vld [vmem:[#allocation2 + $0xe1] sm:$0xff]  ;;  %v226_v55 = vld [vmem:[#allocation2 + $0xf1] sm:$0xff] }
  0x57   :  { %v298_v15 = vadd.f32 %v260_v54, %v184_v6  ;;  %v632_v13 = vmul.f32 0.125, %v524_v49  ;;  %v695_v4 = vmul.f32 0.375, %v524_v49  ;;  %v261_v2 = vmul.f32 0.375, %v223_v47  ;;  %v151_v54 = vld [vmem:[#allocation2 + $0xf8] sm:$0xff] }
  0x58   :  { %v489_v61 = vmul.f32 0.125, %v451_v48  ;;  %948 = vst [vmem:[#allocation7 + $0x38] sm:$0xff] %v916_v23  ;;  %v525_v59 = vadd.f32 %v487_v30, %v411_v26  ;;  %v726_v16 = vadd.f32 %v694_v43, %v629_v5  ;;  %v186_v9 = vmul.f32 0.125, %v148_v1  ;;  %v454_v43 = vld [vmem:[#allocation2 + $0xf3] sm:$0xff]  ;;  %v455_v23 = vld [vmem:[#allocation2 + $0xfb] sm:$0xff] }
  0x59   :  { %v412_v8 = vadd.f32 %v1098_v34, %v298_v15  ;;  %v917_v3 = vadd.f32 %v820_v28, %v632_v13  ;;  %v822_v12 = vadd.f32 %v725_v53, %v695_v4  ;;  %v299_v10 = vadd.f32 %v261_v2, %v185_v20  ;;  %v150_v34 = vld [vmem:[#allocation2 + $0xf0] sm:$0xff]  ;;  %v227_v1 = vld [vmem:[#allocation2 + $0xf9] sm:$0xff] }
  0x5a   :  { %v262_v17 = vmul.f32 0.375, %v224_v32  ;;  %v633_v33 = vmul.f32 0.125, %v525_v59  ;;  %v696_v18 = vmul.f32 0.375, %v525_v59  ;;  %v490_v19 = vmul.f32 0.125, %v452_v7  ;;  %v152_v32 = vld [vmem:[#allocation2 + $0x108] sm:$0xff] }
  0x5b   :  { %v526_v27 = vadd.f32 %v488_v14, %v412_v8  ;;  %949 = vst [vmem:[#allocation7 + $0x40] sm:$0xff] %v917_v3  ;;  %v413_v62 = vadd.f32 %v1100_v38, %v299_v10  ;;  %v727_v11 = vadd.f32 %v695_v4, %v630_v21  ;;  %v187_v30 = vmul.f32 0.125, %v149_v41  ;;  %v228_v59 = vld [vmem:[#allocation2 + $0x109] sm:$0xff] }
  0x5c   :  { %v300_v29 = vadd.f32 %v262_v17, %v186_v9  ;;  %v918_v5 = vadd.f32 %v821_v36, %v633_v33  ;;  %v823_v35 = vadd.f32 %v726_v16, %v696_v18  ;;  %v263_v28 = vmul.f32 0.375, %v225_v24  ;;  %v456_v41 = vld [vmem:[#allocation2 + $0x10b] sm:$0xff] }
  0x5d   :  { %v634_v31 = vmul.f32 0.125, %v526_v27  ;;  %v697_v25 = vmul.f32 0.375, %v526_v27  ;;  %v527_v22 = vadd.f32 %v489_v61, %v413_v62  ;;  %v491_v6 = vmul.f32 0.125, %v453_v60  ;;  %v153_v27 = vld [vmem:[#allocation2 + $0x110] sm:$0xff] }
  0x5e   :  { %v414_v37 = vadd.f32 %v1102_v39, %v300_v29  ;;  %950 = vst [vmem:[#allocation7 + $0x48] sm:$0xff] %v918_v5  ;;  %v728_v38 = vadd.f32 %v696_v18, %v631_v42  ;;  %v188_v49 = vmul.f32 0.125, %v150_v34  ;;  %v301_v53 = vadd.f32 %v263_v28, %v187_v30  ;;  %v229_v60 = vld [vmem:[#allocation2 + $0x111] sm:$0xff] }
  0x5f   :  { %v919_v47 = vadd.f32 %v822_v12, %v634_v31  ;;  %v824_v48 = vadd.f32 %v727_v11, %v697_v25  ;;  %v635_v21 = vmul.f32 0.125, %v527_v22  ;;  %v698_v20 = vmul.f32 0.375, %v527_v22  ;;  %v230_v22 = vld [vmem:[#allocation2 + $0x121] sm:$0xff] }
  0x60   :  { %v528_v14 = vadd.f32 %v490_v19, %v414_v37  ;;  %v264_v26 = vmul.f32 0.375, %v226_v55  ;;  %v492_v36 = vmul.f32 0.125, %v454_v43  ;;  %v729_v39 = vadd.f32 %v697_v25, %v632_v13 }
  0x61   :  { %951 = vst [vmem:[#allocation7 + $0x50] sm:$0xff] %v919_v47  ;;  %v189_v15 = vmul.f32 0.125, %v151_v54  ;;  %v920_v4 = vadd.f32 %v823_v35, %v635_v21  ;;  %v415_v61 = vadd.f32 %v1104_v40, %v301_v53  ;;  %v825_v7 = vadd.f32 %v728_v38, %v698_v20  ;;  %v457_v40 = vld [vmem:[#allocation2 + $0x113] sm:$0xff] }
  0x62   :  { %v636_v2 = vmul.f32 0.125, %v528_v14  ;;  %v302_v42 = vadd.f32 %v264_v26, %v188_v49  ;;  %v699_v8 = vmul.f32 0.375, %v528_v14  ;;  %v265_v16 = vmul.f32 0.375, %v227_v1 }
  0x63   :  { %v493_v9 = vmul.f32 0.125, %v455_v23  ;;  %952 = vst [vmem:[#allocation7 + $0x58] sm:$0xff] %v920_v4  ;;  %v529_v12 = vadd.f32 %v491_v6, %v415_v61  ;;  %v730_v10 = vadd.f32 %v698_v20, %v633_v33  ;;  %v190_v17 = vmul.f32 0.125, %v152_v32  ;;  %v154_v33 = vld [vmem:[#allocation2 + $0x120] sm:$0xff]  ;;  %v155_v23 = vld [vmem:[#allocation2 + $0x128] sm:$0xff] }
  0x64   :  { %v921_v3 = vadd.f32 %v824_v48, %v636_v2  ;;  %v416_v13 = vadd.f32 %v1106_v44, %v302_v42  ;;  %v826_v18 = vadd.f32 %v729_v39, %v699_v8  ;;  %v303_v19 = vadd.f32 %v265_v16, %v189_v15  ;;  %v458_v48 = vld [vmem:[#allocation2 + $0x123] sm:$0xff]  ;;  %v459_v4 = vld [vmem:[#allocation2 + $0x12b] sm:$0xff] }
  0x65   :  { %v266_v24 = vmul.f32 0.375, %v228_v59  ;;  %v637_v62 = vmul.f32 0.125, %v529_v12  ;;  %v700_v29 = vmul.f32 0.375, %v529_v12  ;;  %v494_v11 = vmul.f32 0.125, %v456_v41  ;;  %v231_v32 = vld [vmem:[#allocation2 + $0x129] sm:$0xff]  ;;  %v232_v41 = vld [vmem:[#allocation2 + $0x139] sm:$0xff] }
  0x66   :  { %953 = vst [vmem:[#allocation7 + $0x60] sm:$0xff] %v921_v3  ;;  %v731_v30 = vadd.f32 %v699_v8, %v634_v31  ;;  %v530_v34 = vadd.f32 %v492_v36, %v416_v13  ;;  %v417_v5 = vadd.f32 %v1108_v45, %v303_v19  ;;  %v191_v25 = vmul.f32 0.125, %v153_v27  ;;  %v460_v3 = vld [vmem:[#allocation2 + $0x13b] sm:$0xff] }
  0x67   :  { %v304_v35 = vadd.f32 %v266_v24, %v190_v17  ;;  %v922_v37 = vadd.f32 %v825_v7, %v637_v62  ;;  %v827_v28 = vadd.f32 %v730_v10, %v700_v29  ;;  %v267_v44 = vmul.f32 0.375, %v229_v60  ;;  %v157_v24 = vld [vmem:[#allocation2 + $0x140] sm:$0xff] }
  0x68   :  { %v495_v6 = vmul.f32 0.125, %v457_v40  ;;  %v638_v55 = vmul.f32 0.125, %v530_v34  ;;  %v531_v43 = vadd.f32 %v493_v9, %v417_v5  ;;  %v701_v47 = vmul.f32 0.375, %v530_v34  ;;  %v156_v9 = vld [vmem:[#allocation2 + $0x138] sm:$0xff] }
  0x69   :  { %v418_v54 = vadd.f32 %v1110_v46, %v304_v35  ;;  %954 = vst [vmem:[#allocation7 + $0x68] sm:$0xff] %v922_v37  ;;  %v305_v38 = vadd.f32 %v267_v44, %v191_v25  ;;  %v732_v31 = vadd.f32 %v700_v29, %v635_v21  ;;  %v192_v49 = vmul.f32 0.125, %v154_v33  ;;  %v158_v25 = vld [vmem:[#allocation2 + $0x150] sm:$0xff] }
  0x6a   :  { %v268_v14 = vmul.f32 0.375, %v230_v22  ;;  %v923_v45 = vadd.f32 %v826_v18, %v638_v55  ;;  %v639_v53 = vmul.f32 0.125, %v531_v43  ;;  %v828_v1 = vadd.f32 %v731_v30, %v701_v47  ;;  %v234_v44 = vld [vmem:[#allocation2 + $0x151] sm:$0xff] }
  0x6b   :  { %v532_v20 = vadd.f32 %v494_v11, %v418_v54  ;;  %v419_v26 = vadd.f32 %v1112_v50, %v305_v38  ;;  %v702_v36 = vmul.f32 0.375, %v531_v43  ;;  %v496_v15 = vmul.f32 0.125, %v458_v48  ;;  %v461_v11 = vld [vmem:[#allocation2 + $0x143] sm:$0xff]  ;;  %v159_v48 = vld [vmem:[#allocation2 + $0x158] sm:$0xff] }
  0x6c   :  { %v306_v39 = vadd.f32 %v268_v14, %v192_v49  ;;  %955 = vst [vmem:[#allocation7 + $0x70] sm:$0xff] %v923_v45  ;;  %v924_v46 = vadd.f32 %v827_v28, %v639_v53  ;;  %v733_v59 = vadd.f32 %v701_v47, %v636_v2  ;;  %v193_v16 = vmul.f32 0.125, %v155_v23  ;;  %v235_v45 = vld [vmem:[#allocation2 + $0x159] sm:$0xff] }
  0x6d   :  { %v640_v61 = vmul.f32 0.125, %v532_v20  ;;  %v703_v7 = vmul.f32 0.375, %v532_v20  ;;  %v533_v21 = vadd.f32 %v495_v6, %v419_v26  ;;  %v829_v42 = vadd.f32 %v732_v31, %v702_v36  ;;  %v463_v20 = vld [vmem:[#allocation2 + $0x15b] sm:$0xff] }
  0x6e   :  { %v420_v8 = vadd.f32 %v1114_v51, %v306_v39  ;;  %956 = vst [vmem:[#allocation7 + $0x78] sm:$0xff] %v924_v46  ;;  %v269_v10 = vmul.f32 0.375, %v231_v32  ;;  %v497_v17 = vmul.f32 0.125, %v459_v4  ;;  %v734_v19 = vadd.f32 %v702_v36, %v637_v62  ;;  %v233_v51 = vld [vmem:[#allocation2 + $0x141] sm:$0xff]  ;;  %v462_v62 = vld [vmem:[#allocation2 + $0x153] sm:$0xff] }
  0x6f   :  { %v925_v50 = vadd.f32 %v828_v1, %v640_v61  ;;  %v830_v12 = vadd.f32 %v733_v59, %v703_v7  ;;  %v641_v27 = vmul.f32 0.125, %v533_v21  ;;  %v704_v18 = vmul.f32 0.375, %v533_v21 }
  0x70   :  { %v534_v13 = vadd.f32 %v496_v15, %v420_v8  ;;  %v307_v2 = vadd.f32 %v269_v10, %v193_v16  ;;  %v194_v60 = vmul.f32 0.125, %v156_v9  ;;  %v270_v40 = vmul.f32 0.375, %v232_v41 }
  0x71   :  { %957 = vst [vmem:[#allocation7 + $0x80] sm:$0xff] %v925_v50  ;;  %v498_v29 = vmul.f32 0.125, %v460_v3  ;;  %v926_v30 = vadd.f32 %v829_v42, %v641_v27  ;;  %v831_v5 = vadd.f32 %v734_v19, %v704_v18  ;;  %v735_v37 = vadd.f32 %v703_v7, %v638_v55  ;;  %v160_v7 = vld [vmem:[#allocation2 + $0x168] sm:$0xff]  ;;  %v161_v3 = vld [vmem:[#allocation2 + $0x170] sm:$0xff] }
  0x72   :  { %v642_v34 = vmul.f32 0.125, %v534_v13  ;;  %v705_v35 = vmul.f32 0.375, %v534_v13  ;;  %v421_v33 = vadd.f32 %v1116_v52, %v307_v2  ;;  %v308_v22 = vadd.f32 %v270_v40, %v194_v60  ;;  %v237_v2 = vld [vmem:[#allocation2 + $0x171] sm:$0xff] }
  0x73   :  { %v195_v28 = vmul.f32 0.125, %v157_v24  ;;  %958 = vst [vmem:[#allocation7 + $0x88] sm:$0xff] %v926_v30  ;;  %v271_v43 = vmul.f32 0.375, %v233_v51  ;;  %v499_v54 = vmul.f32 0.125, %v461_v11  ;;  %v736_v47 = vadd.f32 %v704_v18, %v639_v53  ;;  %v464_v24 = vld [vmem:[#allocation2 + $0x16b] sm:$0xff] }
  0x74   :  { %v927_v6 = vadd.f32 %v830_v12, %v642_v34  ;;  %v535_v38 = vadd.f32 %v497_v17, %v421_v33  ;;  %v422_v31 = vadd.f32 %v1118_v56, %v308_v22  ;;  %v832_v49 = vadd.f32 %v735_v37, %v705_v35  ;;  %v236_v56 = vld [vmem:[#allocation2 + $0x169] sm:$0xff]  ;;  %v465_v37 = vld [vmem:[#allocation2 + $0x173] sm:$0xff] }
  0x75   :  { %v196_v14 = vmul.f32 0.125, %v158_v25  ;;  %v309_v52 = vadd.f32 %v271_v43, %v195_v28  ;;  %v272_v1 = vmul.f32 0.375, %v234_v44  ;;  %v500_v55 = vmul.f32 0.125, %v462_v62  ;;  %v162_v28 = vld [vmem:[#allocation2 + $0x180] sm:$0xff] }
  0x76   :  { %959 = vst [vmem:[#allocation7 + $0x90] sm:$0xff] %v927_v6  ;;  %v737_v23 = vadd.f32 %v705_v35, %v640_v61  ;;  %v643_v26 = vmul.f32 0.125, %v535_v38  ;;  %v536_v36 = vadd.f32 %v498_v29, %v422_v31  ;;  %v706_v39 = vmul.f32 0.375, %v535_v38  ;;  %v995_v29 = vld [vmem:[#allocation2] sm:$0xff] }
  0x77   :  { %v197_v15 = vmul.f32 0.125, %v159_v48  ;;  %v423_v32 = vadd.f32 %v1120_v57, %v309_v52  ;;  %v310_v53 = vadd.f32 %v272_v1, %v196_v14  ;;  %v273_v4 = vmul.f32 0.375, %v235_v45  ;;  %v238_v44 = vld [vmem:[#allocation2 + $0x181] sm:$0xff]  ;;  %v239_v1 = vld [vmem:[#allocation2 + $0x189] sm:$0xff] }
  0x78   :  { %v501_v46 = vmul.f32 0.125, %v463_v20  ;;  %v928_v59 = vadd.f32 %v831_v5, %v643_v26  ;;  %v1168_v21 = vmul.f32 0.125, %v536_v36  ;;  %v833_v42 = vadd.f32 %v736_v47, %v706_v39  ;;  %v466_v52 = vld [vmem:[#allocation2 + $0x183] sm:$0xff] }
  0x79   :  { %v707_v8 = vmul.f32 0.375, %v536_v36  ;;  %v537_v16 = vadd.f32 %v499_v54, %v423_v32  ;;  %v424_v9 = vadd.f32 %v1122_v58, %v310_v53  ;;  %v311_v61 = vadd.f32 %v273_v4, %v197_v15  ;;  %v352_v54 = vld [vmem:[#allocation2 + $0x182] sm:$0xff]  ;;  %v353_v15 = vld [vmem:[#allocation2 + $0x18a] sm:$0xff] }
  0x7a   :  { %v738_v41 = vadd.f32 %v706_v39, %v641_v27  ;;  %960 = vst [vmem:[#allocation7 + $0x98] sm:$0xff] %v928_v59  ;;  %v929_v50 = vadd.f32 %v832_v49, %v1168_v21  ;;  %v198_v12 = vmul.f32 0.125, %v160_v7  ;;  %v274_v10 = vmul.f32 0.375, %v236_v56  ;;  %v351_v27 = vld [vmem:[#allocation2 + $0x172] sm:$0xff]  ;;  %v163_v49 = vld [vmem:[#allocation2 + $0x188] sm:$0xff] }
  0x7b   :  { %v834_v57 = vadd.f32 %v737_v23, %v707_v8  ;;  %v1172_v17 = vmul.f32 0.125, %v537_v16  ;;  %v538_v13 = vadd.f32 %v500_v55, %v424_v9  ;;  %v425_v18 = vadd.f32 %v1124_v63, %v311_v61  ;;  %v164_v7 = vld [vmem:[#allocation2 + $0x198] sm:$0xff] }
  0x7c   :  { %v708_v19 = vmul.f32 0.375, %v537_v16  ;;  %961 = vst [vmem:[#allocation7 + $0xa0] sm:$0xff] %v929_v50  ;;  %v312_v60 = vadd.f32 %v274_v10, %v198_v12  ;;  %v739_v58 = vadd.f32 %v707_v8, %v642_v34  ;;  %v199_v40 = vmul.f32 0.125, %v161_v3  ;;  %v240_v16 = vld [vmem:[#allocation2 + $0x199] sm:$0xff] }
  0x7d   :  { %v1175_v51 = vmul.f32 0.125, %v995_v29  ;;  %v930_v11 = vadd.f32 %v833_v42, %v1172_v17  ;;  %v1178_v30 = vmul.f32 0.125, %v538_v13  ;;  %v539_v5 = vadd.f32 %v501_v46, %v425_v18  ;;  %v467_v46 = vld [vmem:[#allocation2 + $0x18b] sm:$0xff]  ;;  %v354_v9 = vld [vmem:[#allocation2 + $0x19a] sm:$0xff] }
  0x7e   :  { %v835_v35 = vadd.f32 %v738_v41, %v708_v19  ;;  %v426_v25 = vadd.f32 %v1126_v0, %v312_v60  ;;  %v502_v63 = vmul.f32 0.125, %v464_v24  ;;  %v709_v33 = vmul.f32 0.375, %v538_v13  ;;  %v165_v18 = vld [vmem:[#allocation2 + $0x1a0] sm:$0xff] }
  0x7f   :  { %v275_v22 = vmul.f32 0.375, %v237_v2  ;;  %962 = vst [vmem:[#allocation7 + $0xa8] sm:$0xff] %v930_v11  ;;  %v931_v34 = vadd.f32 %v834_v57, %v1178_v30  ;;  %v1182_v62 = vmul.f32 0.125, %v539_v5  ;;  %v389_v6 = vmul.f32 0.375, %v351_v27  ;;  %v468_v57 = vld [vmem:[#allocation2 + $0x19b] sm:$0xff] }
  0x80   :  { %v710_v43 = vmul.f32 0.375, %v539_v5  ;;  %v540_v47 = vadd.f32 %v502_v63, %v426_v25  ;;  %v836_v48 = vadd.f32 %v739_v58, %v709_v33  ;;  %v740_v31 = vadd.f32 %v708_v19, %v643_v26  ;;  %v241_v58 = vld [vmem:[#allocation2 + $0x1a1] sm:$0xff] }
  0x81   :  { %v313_v38 = vadd.f32 %v275_v22, %v199_v40  ;;  %963 = vst [vmem:[#allocation7 + $0xb0] sm:$0xff] %v931_v34  ;;  %v932_v0 = vadd.f32 %v835_v35, %v1182_v62  ;;  %v503_v14 = vmul.f32 0.125, %v465_v37  ;;  %v200_v45 = vmul.f32 0.125, %v162_v28  ;;  %v355_v40 = vld [vmem:[#allocation2 + $0x1a2] sm:$0xff]  ;;  %v242_v22 = vld [vmem:[#allocation2 + $0x1b1] sm:$0xff] }
  0x82   :  { %v276_v20 = vmul.f32 0.375, %v238_v44  ;;  %v1185_v55 = vmul.f32 0.125, %v540_v47  ;;  %v837_v36 = vadd.f32 %v740_v31, %v710_v43  ;;  %v390_v39 = vmul.f32 0.375, %v352_v54  ;;  %v469_v35 = vld [vmem:[#allocation2 + $0x1a3] sm:$0xff] }
  0x83   :  { %v427_v23 = vadd.f32 %v389_v6, %v313_v38  ;;  %964 = vst [vmem:[#allocation7 + $0xb8] sm:$0xff] %v932_v0  ;;  %v711_v53 = vmul.f32 0.375, %v540_v47  ;;  %v741_v26 = vadd.f32 %v709_v33, %v1168_v21  ;;  %v201_v4 = vmul.f32 0.125, %v163_v49  ;;  %v356_v6 = vld [vmem:[#allocation2 + $0x1b2] sm:$0xff] }
  0x84   :  { %v314_v32 = vadd.f32 %v276_v20, %v200_v45  ;;  %v933_v56 = vadd.f32 %v836_v48, %v1185_v55  ;;  %v504_v42 = vmul.f32 0.125, %v466_v52  ;;  %v277_v8 = vmul.f32 0.375, %v239_v1  ;;  %v357_v45 = vld [vmem:[#allocation2 + $0x1ba] sm:$0xff] }
  0x85   :  { %v541_v59 = vadd.f32 %v503_v14, %v427_v23  ;;  %v838_v41 = vadd.f32 %v741_v26, %v711_v53  ;;  %v391_v3 = vmul.f32 0.375, %v353_v15  ;;  %v742_v50 = vadd.f32 %v710_v43, %v1172_v17  ;;  %v470_v43 = vld [vmem:[#allocation2 + $0x1b3] sm:$0xff] }
  0x86   :  { %v428_v61 = vadd.f32 %v390_v39, %v314_v32  ;;  %965 = vst [vmem:[#allocation7 + $0xc0] sm:$0xff] %v933_v56  ;;  %v315_v10 = vadd.f32 %v277_v8, %v201_v4  ;;  %v505_v21 = vmul.f32 0.125, %v467_v46  ;;  %v202_v13 = vmul.f32 0.125, %v164_v7  ;;  %v243_v14 = vld [vmem:[#allocation2 + $0x1b9] sm:$0xff] }
  0x87   :  { %v649_v12 = vmul.f32 0.125, %v541_v59  ;;  %v712_v24 = vmul.f32 0.375, %v541_v59  ;;  %v278_v2 = vmul.f32 0.375, %v240_v16  ;;  %v392_v60 = vmul.f32 0.375, %v354_v9 }
  0x88   :  { %v542_v19 = vadd.f32 %v504_v42, %v428_v61  ;;  %v429_v29 = vadd.f32 %v391_v3, %v315_v10  ;;  %v506_v11 = vmul.f32 0.125, %v468_v57  ;;  %v743_v5 = vadd.f32 %v711_v53, %v1178_v30  ;;  %v471_v53 = vld [vmem:[#allocation2 + $0x1bb] sm:$0xff] }
  0x89   :  { %v934_v27 = vadd.f32 %v837_v36, %v649_v12  ;;  %v316_v25 = vadd.f32 %v278_v2, %v202_v13  ;;  %v203_v33 = vmul.f32 0.125, %v165_v18  ;;  %v839_v28 = vadd.f32 %v742_v50, %v712_v24 }
  0x8a   :  { %v903_v17 = vmul.f32 0.125, %v542_v19  ;;  %v713_v63 = vmul.f32 0.375, %v542_v19  ;;  %v543_v37 = vadd.f32 %v505_v21, %v429_v29  ;;  %v279_v44 = vmul.f32 0.375, %v241_v58 }
  0x8b   :  { %966 = vst [vmem:[#allocation7 + $0xc8] sm:$0xff] %v934_v27  ;;  %v393_v34 = vmul.f32 0.375, %v355_v40  ;;  %v430_v47 = vadd.f32 %v392_v60, %v316_v25  ;;  %v507_v38 = vmul.f32 0.125, %v469_v35  ;;  %v744_v30 = vadd.f32 %v712_v24, %v1182_v62 }
  0x8c   :  { %v935_v54 = vadd.f32 %v903_v17, %v838_v41  ;;  %v840_v48 = vadd.f32 %v743_v5, %v713_v63  ;;  %v904_v31 = vmul.f32 0.125, %v543_v37  ;;  %v317_v49 = vadd.f32 %v279_v44, %v203_v33 }
  0x8d   :  { %v280_v0 = vmul.f32 0.375, %v242_v22  ;;  %v544_v20 = vadd.f32 %v506_v11, %v430_v47  ;;  %v714_v52 = vmul.f32 0.375, %v543_v37  ;;  %v394_v1 = vmul.f32 0.375, %v356_v6 }
  0x8e   :  { %967 = vst [vmem:[#allocation7 + $0xd0] sm:$0xff] %v935_v54  ;;  %v508_v23 = vmul.f32 0.125, %v470_v43  ;;  %v936_v36 = vadd.f32 %v904_v31, %v839_v28  ;;  %v431_v39 = vadd.f32 %v393_v34, %v317_v49  ;;  %v745_v32 = vadd.f32 %v713_v63, %v1185_v55 }
  0x8f   :  { %v318_v15 = vadd.f32 %v280_v0, %v1175_v51  ;;  %v905_v26 = vmul.f32 0.125, %v544_v20  ;;  %v281_v4 = vmul.f32 0.375, %v243_v14  ;;  %v395_v46 = vmul.f32 0.375, %v357_v45 }
  0x90   :  { %968 = vst [vmem:[#allocation7 + $0xd8] sm:$0xff] %v936_v36  ;;  %v545_v62 = vadd.f32 %v507_v38, %v431_v39  ;;  %v841_v7 = vadd.f32 %v744_v30, %v714_v52  ;;  %v810_v59 = vmul.f32 0.375, %v544_v20  ;;  %v509_v16 = vmul.f32 0.125, %v471_v53 }
  0x91   :  { %v432_v56 = vadd.f32 %v394_v1, %v318_v15  ;;  %v937_v42 = vadd.f32 %v905_v26, %v840_v48  ;;  %v319_v8 = vadd.f32 %v281_v4, %v1175_v51  ;;  %v746_v9 = vadd.f32 %v714_v52, %v649_v12 }
  0x92   :  { %v906_v61 = vmul.f32 0.125, %v545_v62  ;;  %v842_v3 = vadd.f32 %v810_v59, %v745_v32  ;;  %v811_v55 = vmul.f32 0.375, %v545_v62 }
  0x93   :  { %v546_v41 = vadd.f32 %v508_v23, %v432_v56  ;;  %969 = vst [vmem:[#allocation7 + $0xe0] sm:$0xff] %v937_v42  ;;  %v433_v50 = vadd.f32 %v395_v46, %v319_v8 }
  0x94   :  { %v938_v57 = vadd.f32 %v906_v61, %v841_v7  ;;  %v843_v13 = vadd.f32 %v811_v55, %v746_v9 }
  0x95   :  { %v907_v10 = vmul.f32 0.125, %v546_v41  ;;  %v547_v21 = vadd.f32 %v509_v16, %v433_v50 }
  0x96   :  { %970 = vst [vmem:[#allocation7 + $0xe8] sm:$0xff] %v938_v57 }
  0x97   :  { %v939_v18 = vadd.f32 %v907_v10, %v842_v3  ;;  %v908_v19 = vmul.f32 0.125, %v547_v21 }
  0x99   :  { %971 = vst [vmem:[#allocation7 + $0xf0] sm:$0xff] %v939_v18  ;;  %v940_v24 = vadd.f32 %v908_v19, %v843_v13 }
  0x9b   :  { %972 = vst [vmem:[#allocation7 + $0xf8] sm:$0xff] %v940_v24 }
  0x9c   :  { %1029 = shalt.err (!%p1026_p12)
}
  0x9d   :  { %s1030_s24 = scalar_lea.hbm %s1211_s1, 4096 }
  0x9e   :  { %p1031_p13 = scmp.ne.s32.totalorder %s1211_s1, %s1030_s24  ;;  %p1034_p0 = scmp.lt.u32.totalorder %s1030_s24, %s1211_s1 }
  0xa0   :  { %p1036_p1 = pnand %p1034_p0, %p1031_p13 }
  0xa2   :  { %1039 = shalt.err (!%p1036_p1)
}
  0xa3   :  { %984 = dma.vmem_to_hbm [thread:$0]  %s979_s20, 4096, %s1211_s1, [#allocation6], %s1045_s16, %s1045_s16, %s1046_s17  }
  0xa4   :  { %1042 = dma.done.wait [#allocation6], 4096  }
  0xa5   :  { %1043 = vsyncadd [#allocation6], 4294963200 }
  0xa6   :  { %988 = vsyncpa [#allocation5], 1 }
  0xa7   :  { %989 = vsyncpa [#allocation6], 1 }

</bundles_post_ra>
